<compile_context>
chip_gen: v7x
topology: tpu7x:2x2x1
jax: 0.10.0
libtpu: 0.0.40
codegen_flags: <defaults>
</compile_context>

<pallas_src>
import jax
import jax.numpy as jnp
from jax.experimental import pallas as pl
from jax.experimental.pallas import tpu as pltpu


# ---------------------------------------------------------------------------
# Path A: whole tensor resident in VMEM -> single pass, single grid step.
# ---------------------------------------------------------------------------
def _softmax_single_block_kernel(x_ref, o_ref):
    e = jnp.exp(x_ref[...].astype(jnp.float32))   # exp computed exactly once
    inv = 1.0 / jnp.sum(e)                        # one exact scalar divide
    o_ref[...] = (e * inv).astype(o_ref.dtype)


def _softmax_single_block(x):
    rows, hidden = x.shape
    return pl.pallas_call(
        _softmax_single_block_kernel,
        out_shape=jax.ShapeDtypeStruct((rows, hidden), x.dtype),
        grid=(1,),
        in_specs=[pl.BlockSpec((rows, hidden), lambda i: (0, 0))],
        out_specs=pl.BlockSpec((rows, hidden), lambda i: (0, 0)),
    )(x)


# ---------------------------------------------------------------------------
# Path B, kernel 1: global sum(exp(x)) over large row tiles.
# ---------------------------------------------------------------------------
def _sum_exp_kernel(x_ref, sum_ref, partial_ref):
    i = pl.program_id(0)

    @pl.when(i == 0)
    def _():
        partial_ref[...] = jnp.zeros_like(partial_ref)

    # Elementwise accumulate (VALU); the expensive cross-lane reduce happens
    # only once, on the final tile.
    partial_ref[...] += jnp.exp(x_ref[...].astype(jnp.float32))

    @pl.when(i == pl.num_programs(0) - 1)
    def _():
        sum_ref[0] = jnp.sum(partial_ref[...])


def _sum_exp(x, row_tile):
    rows, hidden = x.shape
    n_tiles = rows // row_tile
    return pl.pallas_call(
        _sum_exp_kernel,
        out_shape=jax.ShapeDtypeStruct((1,), jnp.float32),
        grid_spec=pltpu.PrefetchScalarGridSpec(
            num_scalar_prefetch=0,
            grid=(n_tiles,),
            in_specs=[pl.BlockSpec((row_tile, hidden), lambda i: (i, 0))],
            out_specs=pl.BlockSpec(memory_space=pltpu.MemorySpace.SMEM),
            scratch_shapes=[pltpu.VMEM((row_tile, hidden), jnp.float32)],
        ),
        compiler_params=pltpu.CompilerParams(
            dimension_semantics=("arbitrary",),   # sequential accumulation
        ),
    )(x)


# ---------------------------------------------------------------------------
# Path B, kernel 2: out = exp(x) * (1 / sum), streamed, megacore-parallel.
# ---------------------------------------------------------------------------
def _normalize_kernel(sum_ref, x_ref, o_ref):
    # Per-tile scalar divide (scalar unit, negligible) keeps this axis safely
    # "parallel" -- no cross-tile state.
    inv = 1.0 / sum_ref[0]
    o_ref[...] = (jnp.exp(x_ref[...].astype(jnp.float32)) * inv).astype(o_ref.dtype)


def _normalize(x, sum_exp, row_tile):
    rows, hidden = x.shape
    n_tiles = rows // row_tile
    return pl.pallas_call(
        _normalize_kernel,
        out_shape=jax.ShapeDtypeStruct((rows, hidden), x.dtype),
        grid_spec=pltpu.PrefetchScalarGridSpec(
            num_scalar_prefetch=0,
            grid=(n_tiles,),
            in_specs=[
                pl.BlockSpec(memory_space=pltpu.MemorySpace.SMEM),  # scalar sum
                pl.BlockSpec((row_tile, hidden), lambda i: (i, 0)),
            ],
            out_specs=pl.BlockSpec((row_tile, hidden), lambda i: (i, 0)),
        ),
        compiler_params=pltpu.CompilerParams(
            dimension_semantics=("parallel",),   # independent tiles: let v7x's 2 TCs split it
        ),
    )(sum_exp, x)


# ---------------------------------------------------------------------------
# Wrapper: pick the path and the tile size.
# ---------------------------------------------------------------------------
_SINGLE_PASS_BYTES = 4 << 20   # in+out+temps ~3x this, well under 32 MiB scoped VMEM (v7x-safe)
_TARGET_TILE_BYTES = 2 << 20   # ~2 MiB f32 tiles: 2 in-bufs + 2 out-bufs + partial ~ 10 MiB VMEM


def _pick_row_tile(rows, hidden):
    max_rows = max(8, _TARGET_TILE_BYTES // (hidden * 4))
    best = None
    for cand in range(8, rows + 1, 8):
        if cand > max_rows:
            break
        if rows % cand == 0:
            best = cand
    return best


def global_softmax(x):
    """exp(x) / sum(exp(x)) over ALL elements of x (torch module semantics)."""
    rows, hidden = x.shape
    if rows * hidden * 4 <= _SINGLE_PASS_BYTES:
        return _softmax_single_block(x)
    row_tile = _pick_row_tile(rows, hidden)
    if row_tile is None:
        # TODO(synk): pad/mask ragged row counts for huge inputs; for now fall
        # back to the single-block path (correct, may pressure VMEM).
        return _softmax_single_block(x)
    s = _sum_exp(x, row_tile)
    return _normalize(x, s, row_tile)


if __name__ == "__main__":
    # Small shape consistent with the module's forward (2-D: rows looped over
    # in torch, features on TPU lanes). Exercises the single-pass path.
    x = jax.random.normal(jax.random.PRNGKey(0), (16, 128), dtype=jnp.float32)
    out = jax.block_until_ready(global_softmax(x))
    ref = jnp.exp(x) / jnp.sum(jnp.exp(x))
    assert out.shape == x.shape and out.dtype == x.dtype
    assert jnp.allclose(out, ref, atol=1e-6, rtol=1e-5), "mismatch (single-pass path)"

    # Larger input to exercise the tiled two-kernel path (reduce + normalize).
    x2 = jax.random.normal(jax.random.PRNGKey(1), (8192, 256), dtype=jnp.float32)
    out2 = jax.block_until_ready(global_softmax(x2))
    ref2 = jnp.exp(x2) / jnp.sum(jnp.exp(x2))
    assert jnp.allclose(out2, ref2, rtol=1e-4, atol=1e-9), "mismatch (tiled path)"

    print("KERNEL_OK")
</pallas_src>

<mosaic_0001>
module attributes {stable_mosaic.version = 11 : i64} {
  func.func @_softmax_single_block_kernel(%arg0: i32, %arg1: memref<16x128xf32, #tpu.memory_space<vmem>>, %arg2: memref<16x128xf32, #tpu.memory_space<vmem>>) attributes {dimension_semantics = [#tpu.dimension_semantics<arbitrary>], iteration_bounds = array<i64: 1>, scalar_prefetch = 0 : i64, scratch_operands = 0 : i64, tpu.core_type = #tpu.core_type<tc>, window_params = [{pipeline_mode = #tpu.pipeline_mode<synchronous>, transform_indices = @transform_0, window_bounds = array<i64: 16, 128>}, {pipeline_mode = #tpu.pipeline_mode<synchronous>, transform_indices = @transform_1, window_bounds = array<i64: 16, 128>}]} {
    %c0 = arith.constant 0 : index
    %c0_0 = arith.constant 0 : index
    %0 = vector.load %arg1[%c0, %c0_0] : memref<16x128xf32, #tpu.memory_space<vmem>>, vector<16x128xf32>
    %1 = math.exp %0 : vector<16x128xf32>
    %2 = vector.shape_cast %1 : vector<16x128xf32> to vector<1x16x128xf32>
    %cst = arith.constant dense<0.000000e+00> : vector<1xf32>
    %3 = vector.multi_reduction <add>, %2, %cst [1, 2] : vector<1x16x128xf32> to vector<1xf32>
    %4 = vector.shape_cast %3 : vector<1xf32> to vector<1x1x1xf32>
    %5 = vector.extract %4[0, 0, 0] : f32 from vector<1x1x1xf32>
    %cst_1 = arith.constant 1.000000e+00 : f32
    %6 = arith.divf %cst_1, %5 : f32
    %7 = vector.broadcast %6 : f32 to vector<16x128xf32>
    %8 = arith.mulf %1, %7 : vector<16x128xf32>
    %c0_2 = arith.constant 0 : index
    %c0_3 = arith.constant 0 : index
    %9 = vector.load %arg2[%c0_2, %c0_3] : memref<16x128xf32, #tpu.memory_space<vmem>>, vector<16x128xf32>
    tpu.vector_store %arg2[%c0_2, %c0_3], %8 {strides = array<i32>} : memref<16x128xf32, #tpu.memory_space<vmem>>, vector<16x128xf32>,
    return
  }
  func.func @transform_0(%arg0: i32) -> (i32, i32) {
    %c0_i32 = arith.constant 0 : i32
    %c0_i32_0 = arith.constant 0 : i32
    %c0_i32_1 = arith.constant 0 : i32
    return %c0_i32, %c0_i32_0 : i32, i32
  }
  func.func @transform_1(%arg0: i32) -> (i32, i32) {
    %c0_i32 = arith.constant 0 : i32
    %c0_i32_0 = arith.constant 0 : i32
    %c0_i32_1 = arith.constant 0 : i32
    return %c0_i32, %c0_i32_0 : i32, i32
  }
}

</mosaic_0001>

<bundles_post_ra>
// kernel: tpu_custom_call.1
= control target key start
LH: loop header
LB: loop body
LE: loop exit
PB: predicated region body
PF: predicated region fallthrough
CT: control target
= control target key end

     0   :  { %6 = vsyncpa [#allocation3], 0  ;;  %s170_s0 = inlined_call_operand.hbm [shape: f32[16,128], index: 0, kind: input, shape index: {}]   ;;  %s171_s1 = inlined_call_operand.hbm [shape: f32[16,128], index: 1, kind: output, shape index: {}]  }
   0x1   :  { %7 = vsyncpa [#allocation4], 0  ;;  %s126_s6 = smov [#allocation2]   ;;  %s78_s10 = scalar_lea.hbm %s170_s0, 256 }
   0x2   :  { %s13_s7 = sshll.u32 %s126_s6, 4  ;;  %p79_p0 = scmp.ne.s32.totalorder %s170_s0, %s78_s10  ;;  %s14_s7 = int_to_ptr.vmem [resolvable:$true] %s13_s7 }
   0x3   :  { %p82_p1 = scmp.lt.u32.totalorder %s78_s10, %s170_s0 }
   0x5   :  { %p84_p2 = pnand %p82_p1, %p79_p0 }
   0x7   :  { %87 = shalt.err (!%p84_p2)
}
   0x8   :  { %s88_s15 = scalar_lea.vmem %s14_s7, 256  ;;  %p93_p4 = scmp.lt.s32.totalorder %s14_s7, %s14_s7 }
   0x9   :  { %p89_p3 = scmp.ne.s32.totalorder %s14_s7, %s88_s15  ;;  %p94_p5 = scmp.lt.s32.totalorder %s88_s15, %s88_s15 }
   0xb   :  { %p95_p6 = por %p94_p5, %p93_p4 }
   0xd   :  { %p96_p7 = pnand %p95_p6, %p89_p3 }
   0xf   :  { %99 = shalt.err (!%p96_p7)
}
  0x10   :  { %s127_s16 = smov 128   ;;  %s128_s17 = smov 8  }
  0x11   :  { %19 = dma.hbm_to_vmem [thread:$0]  %s170_s0, 256, %s14_s7, [#allocation3], %s127_s16, %s127_s16, %s128_s17  }
  0x12   :  { %122 = dma.done.wait [#allocation3], 256  }
  0x13   :  { %123 = vsyncadd [#allocation3], 4294967040  ;;  %v23_v0 = vld [vmem:[#allocation2] sm:$0xff]  ;;  %v24_v1 = vld [vmem:[#allocation2 + $0x8] sm:$0xff]  ;;  %s129_s20 = smov [#allocation5]  }
  0x14   :  { %v25_v2 = vmul.f32 1.442695, %v23_v0  ;;  %v27_v3 = vmul.f32 1.442695, %v24_v1  ;;  %s52_s21 = sshll.u32 %s129_s20, 4  ;;  %s53_s21 = int_to_ptr.vmem [resolvable:$true] %s52_s21 }
  0x15   :  { %s100_s23 = scalar_lea.vmem %s53_s21, 256  ;;  %p105_p9 = scmp.lt.s32.totalorder %s53_s21, %s53_s21 }
  0x16   :  { %72 = vpow2.f32 %v25_v2  ;;  %p101_p8 = scmp.ne.s32.totalorder %s53_s21, %s100_s23  ;;  %p106_p10 = scmp.lt.s32.totalorder %s100_s23, %s100_s23 }
  0x17   :  { %74 = vpow2.f32 %v27_v3 }
  0x18   :  { %p107_p11 = por %p106_p10, %p105_p9 }
  0x1a   :  { %p108_p12 = pnand %p107_p11, %p101_p8 }
  0x20   :  { %v73_v4 = vpop.eup %72 }
  0x21   :  { %v75_v5 = vpop.eup %74 }
  0x22   :  { %v29_v6 = vadd.f32 %v75_v5, %v73_v4 }
  0x24   :  { %30 = vadd.xlane.f32.xlu0 %v29_v6 }
  0xb1   :  { %v31_v7 = vpop.xlane.xlu0 %30 }
  0xb2   :  { %v32_v8 = vrot.slane %v31_v7, 4 }
  0xb4   :  { %v33_v9 = vadd.f32 %v32_v8, %v31_v7 }
  0xb6   :  { %v34_v10 = vrot.slane %v33_v9, 2 }
  0xb8   :  { %v35_v11 = vadd.f32 %v34_v10, %v33_v9 }
  0xba   :  { %v36_v12 = vrot.slane %v35_v11, 1 }
  0xbc   :  { %v37_v13 = vadd.f32 %v36_v12, %v35_v11 }
  0xbe   :  { %64 = vpush %v37_v13 }
  0xef   :  { %s65_s0 = spop %64 }
  0xf0   :  { %v39_v14 = vstv %s65_s0 }
  0xf1   :  { %76 = vrcp.f32 %v39_v14 }
  0xfb   :  { %v77_v15 = vpop.eup %76 }
  0xfc   :  { %66 = vpush %v77_v15 }
 0x12d   :  { %s67_s22 = spop %66 }
 0x12e   :  { %v42_v16 = vstv %s67_s22 }
 0x12f   :  { %v43_v17 = vmul.f32 %v73_v4, %v42_v16  ;;  %v44_v18 = vmul.f32 %v75_v5, %v42_v16 }
 0x131   :  { %45 = vst [vmem:[#allocation5] sm:$0xff] %v43_v17  ;;  %46 = vst [vmem:[#allocation5 + $0x8] sm:$0xff] %v44_v18 }
 0x132   :  { %111 = shalt.err (!%p108_p12)
}
 0x133   :  { %s112_s26 = scalar_lea.hbm %s171_s1, 256 }
 0x134   :  { %p113_p13 = scmp.ne.s32.totalorder %s171_s1, %s112_s26  ;;  %p116_p0 = scmp.lt.u32.totalorder %s112_s26, %s171_s1 }
 0x136   :  { %p118_p1 = pnand %p116_p0, %p113_p13 }
 0x138   :  { %121 = shalt.err (!%p118_p1)
}
 0x139   :  { %58 = dma.vmem_to_hbm [thread:$0]  %s53_s21, 256, %s171_s1, [#allocation4], %s127_s16, %s127_s16, %s128_s17  }
 0x13a   :  { %124 = dma.done.wait [#allocation4], 256  }
 0x13b   :  { %125 = vsyncadd [#allocation4], 4294967040 }
 0x13c   :  { %62 = vsyncpa [#allocation3], 1 }
 0x13d   :  { %63 = vsyncpa [#allocation4], 1 }

</bundles_post_ra>
